<compile_context>
chip_gen: v7x
topology: tpu7x:2x2x1
jax: 0.10.0
libtpu: 0.0.40
codegen_flags: <defaults>
</compile_context>

<pallas_src>
import math

import jax
import jax.numpy as jnp
from jax.experimental import pallas as pl
from jax.experimental.pallas import tpu as pltpu


# ----------------------------------------------------------------------------
# Pallas kernel: one 1-D S4 layer on a lane-dense (TILE_R, S*C) slab.
# ----------------------------------------------------------------------------
def s4_layer_kernel(u_ref, a_ref, w_ref, b_ref, o_ref):
    # bf16 MXU operands, f32 accumulation.
    u = u_ref[...].astype(jnp.bfloat16)                               # (TR, S*C)

    # Causal per-channel SSM convolution + D*u skip, as ONE MXU matmul:
    #   a_ref = block-diag Toeplitz with the skip folded onto its diagonal.
    y = jnp.dot(u, a_ref[...], preferred_element_type=jnp.float32)    # (TR, S*C)

    # GELU (tanh approximation) in f32 - transcendental goes to the EUP slot.
    # TODO(synk): chunk this epilogue over 128-row sub-slices if tile_r is ever
    #   raised above ~256 rows (vreg pressure).
    c0 = 0.7978845608028654  # sqrt(2/pi)
    y = 0.5 * y * (1.0 + jnp.tanh(c0 * (y + 0.044715 * (y * y * y))))

    # Position-wise output linear (Conv1d k=1) as kron(I_S, W^T) matmul + bias.
    y = jnp.dot(y.astype(jnp.bfloat16), w_ref[...],
                preferred_element_type=jnp.float32)
    y = y + b_ref[...][0:1, :]   # (8, S*C) unmasked tile; rows are identical.

    o_ref[...] = y.astype(o_ref.dtype)


def s4_layer_apply(u_flat, params, out_dtype):
    """Apply one S4 layer.  u_flat: (R, S*C) lane-dense (rows = independent seqs)."""
    R, SC = u_flat.shape
    a_bd, w_kron, bvec = params
    assert R % 8 == 0, "row count must satisfy the (8, 128) sublane rule"

    # Single block unless there are enough rows to amortize the constant-weight
    # DMAs over many row tiles; never split tiny row counts across grid steps.
    if R >= 512 and R % 256 == 0:
        tile_r = 256
    else:
        tile_r = R
    grid = (R // tile_r,)

    return pl.pallas_call(
        s4_layer_kernel,
        out_shape=jax.ShapeDtypeStruct((R, SC), out_dtype),
        grid_spec=pltpu.PrefetchScalarGridSpec(
            num_scalar_prefetch=0,
            grid=grid,
            in_specs=[
                pl.BlockSpec((tile_r, SC), lambda i: (i, 0)),  # activations
                pl.BlockSpec((SC, SC), lambda i: (0, 0)),      # Toeplitz+skip (const, bf16)
                pl.BlockSpec((SC, SC), lambda i: (0, 0)),      # kron(I_S, W^T) (const, bf16)
                pl.BlockSpec((8, SC), lambda i: (0, 0)),       # bias, replicated rows (const)
            ],
            out_specs=pl.BlockSpec((tile_r, SC), lambda i: (i, 0)),
        ),
        compiler_params=pltpu.CompilerParams(
            dimension_semantics=("parallel",)),
    )(u_flat, a_bd, w_kron, bvec)


# ----------------------------------------------------------------------------
# Deterministic parameter setup (plain JAX glue, runs once).
# ----------------------------------------------------------------------------
def init_s4_params(key, C_feat, N, S, dt_min=1e-3, dt_max=0.1):
    """Build one S4 layer's lane-dense operands from an S4D-style diagonal SSM."""
    k1, k2, k3, k4, k5, k6 = jax.random.split(key, 6)

    # step sizes
    log_dt = (jax.random.uniform(k1, (C_feat,)) *
              (math.log(dt_max) - math.log(dt_min)) + math.log(dt_min))
    dt = jnp.exp(log_dt)                                        # (C,)

    # diagonal A (S4D-Lin), B = 1, random complex C
    n = jnp.arange(N // 2)
    A = (-0.5 + 1j * math.pi * n).astype(jnp.complex64)         # (N/2,)
    Cc = ((jax.random.normal(k2, (C_feat, N // 2)) +
           1j * jax.random.normal(k3, (C_feat, N // 2))) *
          math.sqrt(0.5)).astype(jnp.complex64)                 # (C, N/2)

    # ZOH discretization -> convolution kernel K[c, l]
    dtA = dt[:, None].astype(jnp.complex64) * A[None, :]        # (C, N/2)
    coef = Cc * (jnp.exp(dtA) - 1.0) / A                        # (C, N/2)
    l = jnp.arange(S)
    vander = jnp.exp(dtA[:, :, None] * l[None, None, :])        # (C, N/2, S)
    K = 2.0 * jnp.real(jnp.einsum('cn,cnl->cl', coef, vander))  # (C, S)
    K = K.astype(jnp.float32)

    # D skip, output linear (Conv1d H->H, kernel 1)
    D = jax.random.normal(k4, (C_feat,), dtype=jnp.float32)
    bound = 1.0 / math.sqrt(C_feat)
    W = jax.random.uniform(k5, (C_feat, C_feat), minval=-bound, maxval=bound,
                           dtype=jnp.float32)                   # (C_out, C_in)
    bias = jax.random.uniform(k6, (C_feat,), minval=-bound, maxval=bound,
                              dtype=jnp.float32)

    # --- lane-dense MXU operands (stored in bf16; f32 accumulation in-kernel) --
    # Block-diagonal causal Toeplitz with the D*u skip folded onto the diagonal:
    #   A_bd[m*C + c, l*C + c] = K[c, l-m] (l >= m)  +  D[c] * (l == m)
    K_lc = K.T                                                  # (S, C)
    lag = l[None, :] - l[:, None]                               # lag[m, l] = l - m
    T = jnp.where((lag >= 0)[..., None],
                  K_lc[jnp.clip(lag, 0, S - 1)], 0.0)           # (S_m, S_l, C)
    T = T + jnp.eye(S)[:, :, None] * D[None, None, :]           # fold skip on l == m
    A_bd = jnp.einsum('mlc,cd->mcld', T,
                      jnp.eye(C_feat, dtype=jnp.float32))       # (S, C, S, C)
    A_bd = A_bd.reshape(S * C_feat, S * C_feat).astype(jnp.bfloat16)

    # kron(I_S, W^T):  W_kron[l*C + c_in, k*C + c_out] = W[c_out, c_in] * (l == k)
    W_kron = jnp.einsum('lk,oc->lcko', jnp.eye(S, dtype=jnp.float32), W)
    W_kron = W_kron.reshape(S * C_feat, S * C_feat).astype(jnp.bfloat16)

    # bias, replicated to a full (8, S*C) tile for an unmasked load:
    #   bvec[r, l*C + c] = bias[c]
    bvec = jnp.tile(bias[None, :], (8, S)).astype(jnp.float32)  # (8, S*C)

    return (A_bd, W_kron, bvec)


# ----------------------------------------------------------------------------
# StateSpace2D forward (matches the PyTorch axis gymnastics exactly).
# ----------------------------------------------------------------------------
def state_space_2d_forward(u, params1, params2):
    """u: (B, H, L) with L = s*s.  Returns (y, new_state) with y: (B, H, L)."""
    B, C, L = u.shape
    s = int(math.sqrt(L))
    assert s * s == L

    # (B, H, L) -> (B, L, H) -> (b, h, w, c), then flatten to lane-dense slabs.
    x = jnp.transpose(u, (0, 2, 1)).reshape(B, s, s, C)

    # s4_1 along w: rows = b*h, lanes = w*C + c.  Intermediate kept in bf16.
    y = s4_layer_apply(x.reshape(B * s, s * C), params1,
                       out_dtype=jnp.bfloat16)                    # (b*h, w*C+c)

    # h <-> w transpose for the second layer (left to XLA; see TODO at top).
    y = y.reshape(B, s, s, C)
    y = jnp.transpose(y, (0, 2, 1, 3)).reshape(B * s, s * C)

    # s4_2 along h: rows = b*w, lanes = h*C + c.  Final output back in f32.
    y = s4_layer_apply(y, params2, out_dtype=u.dtype)             # (b*w, h*C+c)

    # back to (b, h, w, c) -> (B, H*W, C) -> (B, H, L)
    y = y.reshape(B, s, s, C)               # [b, w, h, c]
    y = jnp.transpose(y, (0, 2, 1, 3))      # [b, h, w, c]
    y = y.reshape(B, s * s, C)
    y = jnp.transpose(y, (0, 2, 1))
    return y, [None, None]


if __name__ == "__main__":
    key = jax.random.PRNGKey(0)
    k_in, k_p1, k_p2 = jax.random.split(key, 3)

    B = 2          # batch
    C = 16         # feature channels (H in the module's (B, H, L) convention)
    s = 16         # spatial side -> L = s*s = 256
    N = 32         # SSM state size (d_model of the HiPPO projection)
    L = s * s

    u = jax.random.normal(k_in, (B, C, L), dtype=jnp.float32)

    params1 = init_s4_params(k_p1, C, N, s)
    params2 = init_s4_params(k_p2, C, N, s)   # tie=False -> independent second layer

    fwd = jax.jit(state_space_2d_forward)
    y, new_state = fwd(u, params1, params2)
    y = jax.block_until_ready(y)
    assert y.shape == (B, C, L) and y.dtype == jnp.float32
    assert bool(jnp.all(jnp.isfinite(y)))
    print("KERNEL_OK")
</pallas_src>

<mosaic_0001>
module attributes {stable_mosaic.version = 11 : i64} {
  func.func @s4_layer_kernel(%arg0: i32, %arg1: memref<32x256xf32, #tpu.memory_space<vmem>>, %arg2: memref<256x256xbf16, #tpu.memory_space<vmem>>, %arg3: memref<256x256xbf16, #tpu.memory_space<vmem>>, %arg4: memref<8x256xf32, #tpu.memory_space<vmem>>, %arg5: memref<32x256xbf16, #tpu.memory_space<vmem>>) attributes {dimension_semantics = [#tpu.dimension_semantics<parallel>], iteration_bounds = array<i64: 1>, scalar_prefetch = 0 : i64, scratch_operands = 0 : i64, tpu.core_type = #tpu.core_type<tc>, window_params = [{transform_indices = @transform_0, window_bounds = array<i64: 32, 256>}, {pipeline_mode = #tpu.pipeline_mode<synchronous>, transform_indices = @transform_1, window_bounds = array<i64: 256, 256>}, {pipeline_mode = #tpu.pipeline_mode<synchronous>, transform_indices = @transform_2, window_bounds = array<i64: 256, 256>}, {pipeline_mode = #tpu.pipeline_mode<synchronous>, transform_indices = @transform_3, window_bounds = array<i64: 8, 256>}, {transform_indices = @transform_4, window_bounds = array<i64: 32, 256>}]} {
    %c0 = arith.constant 0 : index
    %c0_0 = arith.constant 0 : index
    %0 = vector.load %arg1[%c0, %c0_0] : memref<32x256xf32, #tpu.memory_space<vmem>>, vector<32x256xf32>
    %1 = arith.truncf %0 : vector<32x256xf32> to vector<32x256xbf16>
    %c0_1 = arith.constant 0 : index
    %c0_2 = arith.constant 0 : index
    %2 = vector.load %arg2[%c0_1, %c0_2] : memref<256x256xbf16, #tpu.memory_space<vmem>>, vector<256x256xbf16>
    %cst = arith.constant dense<0.000000e+00> : vector<32x256xf32>
    %3 = tpu.matmul %1, %2, %cst {dimension_numbers = #tpu.dot_dimension_numbers<[1], [0], [0], [1], [0, 0, 1, 1], [], []>} : vector<32x256xbf16>, vector<256x256xbf16>, vector<32x256xf32> -> vector<32x256xf32>
    %cst_3 = arith.constant 5.000000e-01 : f32
    %4 = vector.broadcast %cst_3 : f32 to vector<32x256xf32>
    %5 = arith.mulf %4, %3 : vector<32x256xf32>
    %6 = arith.mulf %3, %3 : vector<32x256xf32>
    %7 = arith.mulf %6, %3 : vector<32x256xf32>
    %cst_4 = arith.constant 4.471500e-02 : f32
    %8 = vector.broadcast %cst_4 : f32 to vector<32x256xf32>
    %9 = arith.mulf %8, %7 : vector<32x256xf32>
    %10 = arith.addf %3, %9 : vector<32x256xf32>
    %cst_5 = arith.constant 0.797884583 : f32
    %11 = vector.broadcast %cst_5 : f32 to vector<32x256xf32>
    %12 = arith.mulf %11, %10 : vector<32x256xf32>
    %13 = math.tanh %12 : vector<32x256xf32>
    %cst_6 = arith.constant 1.000000e+00 : f32
    %14 = vector.broadcast %cst_6 : f32 to vector<32x256xf32>
    %15 = arith.addf %14, %13 : vector<32x256xf32>
    %16 = arith.mulf %5, %15 : vector<32x256xf32>
    %17 = arith.truncf %16 : vector<32x256xf32> to vector<32x256xbf16>
    %c0_7 = arith.constant 0 : index
    %c0_8 = arith.constant 0 : index
    %18 = vector.load %arg3[%c0_7, %c0_8] : memref<256x256xbf16, #tpu.memory_space<vmem>>, vector<256x256xbf16>
    %cst_9 = arith.constant dense<0.000000e+00> : vector<32x256xf32>
    %19 = tpu.matmul %17, %18, %cst_9 {dimension_numbers = #tpu.dot_dimension_numbers<[1], [0], [0], [1], [0, 0, 1, 1], [], []>} : vector<32x256xbf16>, vector<256x256xbf16>, vector<32x256xf32> -> vector<32x256xf32>
    %c0_10 = arith.constant 0 : index
    %c0_11 = arith.constant 0 : index
    %20 = vector.load %arg4[%c0_10, %c0_11] : memref<8x256xf32, #tpu.memory_space<vmem>>, vector<8x256xf32>
    %21 = vector.extract_strided_slice %20 {offsets = [0, 0], sizes = [1, 256], strides = [1, 1]} : vector<8x256xf32> to vector<1x256xf32>
    %22 = vector.broadcast %21 : vector<1x256xf32> to vector<32x256xf32>
    %23 = arith.addf %19, %22 : vector<32x256xf32>
    %24 = arith.truncf %23 : vector<32x256xf32> to vector<32x256xbf16>
    %c0_12 = arith.constant 0 : index
    %c0_13 = arith.constant 0 : index
    %25 = vector.load %arg5[%c0_12, %c0_13] : memref<32x256xbf16, #tpu.memory_space<vmem>>, vector<32x256xbf16>
    tpu.vector_store %arg5[%c0_12, %c0_13], %24 {strides = array<i32>} : memref<32x256xbf16, #tpu.memory_space<vmem>>, vector<32x256xbf16>,
    return
  }
  func.func @transform_0(%arg0: i32) -> (i32, i32) {
    %c0_i32 = arith.constant 0 : i32
    %c0_i32_0 = arith.constant 0 : i32
    return %arg0, %c0_i32 : i32, i32
  }
  func.func @transform_1(%arg0: i32) -> (i32, i32) {
    %c0_i32 = arith.constant 0 : i32
    %c0_i32_0 = arith.constant 0 : i32
    %c0_i32_1 = arith.constant 0 : i32
    return %c0_i32, %c0_i32_0 : i32, i32
  }
  func.func @transform_2(%arg0: i32) -> (i32, i32) {
    %c0_i32 = arith.constant 0 : i32
    %c0_i32_0 = arith.constant 0 : i32
    %c0_i32_1 = arith.constant 0 : i32
    return %c0_i32, %c0_i32_0 : i32, i32
  }
  func.func @transform_3(%arg0: i32) -> (i32, i32) {
    %c0_i32 = arith.constant 0 : i32
    %c0_i32_0 = arith.constant 0 : i32
    %c0_i32_1 = arith.constant 0 : i32
    return %c0_i32, %c0_i32_0 : i32, i32
  }
  func.func @transform_4(%arg0: i32) -> (i32, i32) {
    %c0_i32 = arith.constant 0 : i32
    %c0_i32_0 = arith.constant 0 : i32
    return %arg0, %c0_i32 : i32, i32
  }
}

module attributes {stable_mosaic.version = 11 : i64} {
  func.func @s4_layer_kernel(%arg0: i32, %arg1: memref<32x256xbf16, #tpu.memory_space<vmem>>, %arg2: memref<256x256xbf16, #tpu.memory_space<vmem>>, %arg3: memref<256x256xbf16, #tpu.memory_space<vmem>>, %arg4: memref<8x256xf32, #tpu.memory_space<vmem>>, %arg5: memref<32x256xf32, #tpu.memory_space<vmem>>) attributes {dimension_semantics = [#tpu.dimension_semantics<parallel>], iteration_bounds = array<i64: 1>, scalar_prefetch = 0 : i64, scratch_operands = 0 : i64, tpu.core_type = #tpu.core_type<tc>, window_params = [{transform_indices = @transform_0, window_bounds = array<i64: 32, 256>}, {pipeline_mode = #tpu.pipeline_mode<synchronous>, transform_indices = @transform_1, window_bounds = array<i64: 256, 256>}, {pipeline_mode = #tpu.pipeline_mode<synchronous>, transform_indices = @transform_2, window_bounds = array<i64: 256, 256>}, {pipeline_mode = #tpu.pipeline_mode<synchronous>, transform_indices = @transform_3, window_bounds = array<i64: 8, 256>}, {transform_indices = @transform_4, window_bounds = array<i64: 32, 256>}]} {
    %c0 = arith.constant 0 : index
    %c0_0 = arith.constant 0 : index
    %0 = vector.load %arg1[%c0, %c0_0] : memref<32x256xbf16, #tpu.memory_space<vmem>>, vector<32x256xbf16>
    %c0_1 = arith.constant 0 : index
    %c0_2 = arith.constant 0 : index
    %1 = vector.load %arg2[%c0_1, %c0_2] : memref<256x256xbf16, #tpu.memory_space<vmem>>, vector<256x256xbf16>
    %cst = arith.constant dense<0.000000e+00> : vector<32x256xf32>
    %2 = tpu.matmul %0, %1, %cst {dimension_numbers = #tpu.dot_dimension_numbers<[1], [0], [0], [1], [0, 0, 1, 1], [], []>} : vector<32x256xbf16>, vector<256x256xbf16>, vector<32x256xf32> -> vector<32x256xf32>
    %cst_3 = arith.constant 5.000000e-01 : f32
    %3 = vector.broadcast %cst_3 : f32 to vector<32x256xf32>
    %4 = arith.mulf %3, %2 : vector<32x256xf32>
    %5 = arith.mulf %2, %2 : vector<32x256xf32>
    %6 = arith.mulf %5, %2 : vector<32x256xf32>
    %cst_4 = arith.constant 4.471500e-02 : f32
    %7 = vector.broadcast %cst_4 : f32 to vector<32x256xf32>
    %8 = arith.mulf %7, %6 : vector<32x256xf32>
    %9 = arith.addf %2, %8 : vector<32x256xf32>
    %cst_5 = arith.constant 0.797884583 : f32
    %10 = vector.broadcast %cst_5 : f32 to vector<32x256xf32>
    %11 = arith.mulf %10, %9 : vector<32x256xf32>
    %12 = math.tanh %11 : vector<32x256xf32>
    %cst_6 = arith.constant 1.000000e+00 : f32
    %13 = vector.broadcast %cst_6 : f32 to vector<32x256xf32>
    %14 = arith.addf %13, %12 : vector<32x256xf32>
    %15 = arith.mulf %4, %14 : vector<32x256xf32>
    %16 = arith.truncf %15 : vector<32x256xf32> to vector<32x256xbf16>
    %c0_7 = arith.constant 0 : index
    %c0_8 = arith.constant 0 : index
    %17 = vector.load %arg3[%c0_7, %c0_8] : memref<256x256xbf16, #tpu.memory_space<vmem>>, vector<256x256xbf16>
    %cst_9 = arith.constant dense<0.000000e+00> : vector<32x256xf32>
    %18 = tpu.matmul %16, %17, %cst_9 {dimension_numbers = #tpu.dot_dimension_numbers<[1], [0], [0], [1], [0, 0, 1, 1], [], []>} : vector<32x256xbf16>, vector<256x256xbf16>, vector<32x256xf32> -> vector<32x256xf32>
    %c0_10 = arith.constant 0 : index
    %c0_11 = arith.constant 0 : index
    %19 = vector.load %arg4[%c0_10, %c0_11] : memref<8x256xf32, #tpu.memory_space<vmem>>, vector<8x256xf32>
    %20 = vector.extract_strided_slice %19 {offsets = [0, 0], sizes = [1, 256], strides = [1, 1]} : vector<8x256xf32> to vector<1x256xf32>
    %21 = vector.broadcast %20 : vector<1x256xf32> to vector<32x256xf32>
    %22 = arith.addf %18, %21 : vector<32x256xf32>
    %c0_12 = arith.constant 0 : index
    %c0_13 = arith.constant 0 : index
    %23 = vector.load %arg5[%c0_12, %c0_13] : memref<32x256xf32, #tpu.memory_space<vmem>>, vector<32x256xf32>
    tpu.vector_store %arg5[%c0_12, %c0_13], %22 {strides = array<i32>} : memref<32x256xf32, #tpu.memory_space<vmem>>, vector<32x256xf32>,
    return
  }
  func.func @transform_0(%arg0: i32) -> (i32, i32) {
    %c0_i32 = arith.constant 0 : i32
    %c0_i32_0 = arith.constant 0 : i32
    return %arg0, %c0_i32 : i32, i32
  }
  func.func @transform_1(%arg0: i32) -> (i32, i32) {
    %c0_i32 = arith.constant 0 : i32
    %c0_i32_0 = arith.constant 0 : i32
    %c0_i32_1 = arith.constant 0 : i32
    return %c0_i32, %c0_i32_0 : i32, i32
  }
  func.func @transform_2(%arg0: i32) -> (i32, i32) {
    %c0_i32 = arith.constant 0 : i32
    %c0_i32_0 = arith.constant 0 : i32
    %c0_i32_1 = arith.constant 0 : i32
    return %c0_i32, %c0_i32_0 : i32, i32
  }
  func.func @transform_3(%arg0: i32) -> (i32, i32) {
    %c0_i32 = arith.constant 0 : i32
    %c0_i32_0 = arith.constant 0 : i32
    %c0_i32_1 = arith.constant 0 : i32
    return %c0_i32, %c0_i32_0 : i32, i32
  }
  func.func @transform_4(%arg0: i32) -> (i32, i32) {
    %c0_i32 = arith.constant 0 : i32
    %c0_i32_0 = arith.constant 0 : i32
    return %arg0, %c0_i32 : i32, i32
  }
}

</mosaic_0001>

<bundles_post_ra>
// kernel: state_space_2d_forward.3
= control target key start
LH: loop header
LB: loop body
LE: loop exit
PB: predicated region body
PF: predicated region fallthrough
CT: control target
= control target key end

     0   :  { %s1074_s1 = inlined_call_operand.vmem [shape: bf16[256,256], index: 1, kind: input, shape index: {}]   ;;  %s1075_s0 = inlined_call_operand.vmem [shape: bf16[32,256], index: 0, kind: input, shape index: {}]   ;;  %s1076_s2 = inlined_call_operand.vmem [shape: bf16[256,256], index: 2, kind: input, shape index: {}]   ;;  %s1077_s3 = inlined_call_operand.vmem [shape: f32[8,256], index: 3, kind: input, shape index: {}]   ;;  %s1078_s4 = inlined_call_operand.vmem [shape: f32[32,256], index: 4, kind: output, shape index: {}]  }
   0x1   :  { %v697_v0 = vld [vmem:[%s1074_s1 + $0x4] ss:$8 sps:$4 sm:$0xff]   ;;  %v699_v1 = vld [vmem:[%s1074_s1] ss:$8 sps:$4 sm:$0xff]   ;;  %v700_v2 = vld [vmem:[%s1074_s1 + $0x14] ss:$8 sps:$4 sm:$0xff]  }
   0x2   :  { %233 = vmatprep.subr.bf16.mxu0 %v697_v0  ;;  %v702_v3 = vld [vmem:[%s1074_s1 + $0x10] ss:$8 sps:$4 sm:$0xff]   ;;  %v703_v4 = vld [vmem:[%s1074_s1 + $0x24] ss:$8 sps:$4 sm:$0xff]   ;;  %v705_v5 = vld [vmem:[%s1074_s1 + $0x20] ss:$8 sps:$4 sm:$0xff]  }
   0x3   :  { %234 = vmatpush1.bf16.msra.mxu0 %v699_v1  ;;  %v706_v6 = vld [vmem:[%s1074_s1 + $0x34] ss:$8 sps:$4 sm:$0xff]   ;;  %v708_v7 = vld [vmem:[%s1074_s1 + $0x30] ss:$8 sps:$4 sm:$0xff]   ;;  %v709_v8 = vld [vmem:[%s1074_s1 + $0x44] ss:$8 sps:$4 sm:$0xff]  }
   0x4   :  { %235 = vmatprep.subr.bf16.mxu0 %v700_v2  ;;  %v711_v9 = vld [vmem:[%s1074_s1 + $0x40] ss:$8 sps:$4 sm:$0xff]   ;;  %v712_v10 = vld [vmem:[%s1074_s1 + $0x54] ss:$8 sps:$4 sm:$0xff]   ;;  %v714_v11 = vld [vmem:[%s1074_s1 + $0x50] ss:$8 sps:$4 sm:$0xff]  }
   0x5   :  { %v715_v12 = vld [vmem:[%s1074_s1 + $0x64] ss:$8 sps:$4 sm:$0xff]   ;;  %v717_v14 = vld [vmem:[%s1074_s1 + $0x60] ss:$8 sps:$4 sm:$0xff]   ;;  %v718_v15 = vld [vmem:[%s1074_s1 + $0x74] ss:$8 sps:$4 sm:$0xff]  }
   0x6   :  { %v747_v13 = vld [vmem:[%s1075_s0 + $0x4] ss:$8 sps:$4 sm:$0xff]   ;;  %v753_v17 = vld [vmem:[%s1076_s2] ss:$8 sps:$4 sm:$0xff]   ;;  %v720_v18 = vld [vmem:[%s1074_s1 + $0x70] ss:$8 sps:$4 sm:$0xff]  }
   0x7   :  { %236 = vmatpush1.bf16.msra.mxu0 %v702_v3  ;;  %265 = vmatprep.mubr.bf16.mxu0 %v747_v13  ;;  %v751_v16 = vld [vmem:[%s1076_s2 + $0x4] ss:$8 sps:$4 sm:$0xff]   ;;  %v754_v19 = vld [vmem:[%s1076_s2 + $0x14] ss:$8 sps:$4 sm:$0xff]   ;;  %v756_v21 = vld [vmem:[%s1076_s2 + $0x10] ss:$8 sps:$4 sm:$0xff]  }
   0x8   :  { %237 = vmatprep.subr.bf16.mxu0 %v703_v4  ;;  %564 = vmatprep.subr.bf16.mxu1 %v751_v16  ;;  %v721_v20 = vld [vmem:[%s1074_s1 + $0x84] ss:$8 sps:$4 sm:$0xff]   ;;  %v723_v23 = vld [vmem:[%s1074_s1 + $0x80] ss:$8 sps:$4 sm:$0xff]   ;;  %v724_v24 = vld [vmem:[%s1074_s1 + $0x94] ss:$8 sps:$4 sm:$0xff]  }
   0x9   :  { %565 = vmatpush1.bf16.msra.mxu1 %v753_v17  ;;  %v757_v22 = vld [vmem:[%s1076_s2 + $0x24] ss:$8 sps:$4 sm:$0xff]   ;;  %v759_v25 = vld [vmem:[%s1076_s2 + $0x20] ss:$8 sps:$4 sm:$0xff]   ;;  %v760_v26 = vld [vmem:[%s1076_s2 + $0x34] ss:$8 sps:$4 sm:$0xff]  }
   0xa   :  { %566 = vmatprep.subr.bf16.mxu1 %v754_v19  ;;  %v726_v27 = vld [vmem:[%s1074_s1 + $0x90] ss:$8 sps:$4 sm:$0xff]   ;;  %v727_v28 = vld [vmem:[%s1074_s1 + $0xa4] ss:$8 sps:$4 sm:$0xff]   ;;  %v729_v31 = vld [vmem:[%s1074_s1 + $0xa0] ss:$8 sps:$4 sm:$0xff]  }
   0xb   :  { %238 = vmatpush1.bf16.msra.mxu0 %v705_v5  ;;  %v762_v29 = vld [vmem:[%s1076_s2 + $0x30] ss:$8 sps:$4 sm:$0xff]   ;;  %v763_v30 = vld [vmem:[%s1076_s2 + $0x44] ss:$8 sps:$4 sm:$0xff]   ;;  %v765_v32 = vld [vmem:[%s1076_s2 + $0x40] ss:$8 sps:$4 sm:$0xff]  }
   0xc   :  { %239 = vmatprep.subr.bf16.mxu0 %v706_v6  ;;  %v730_v33 = vld [vmem:[%s1074_s1 + $0xb4] ss:$8 sps:$4 sm:$0xff]   ;;  %v732_v35 = vld [vmem:[%s1074_s1 + $0xb0] ss:$8 sps:$4 sm:$0xff]   ;;  %v733_v37 = vld [vmem:[%s1074_s1 + $0xc4] ss:$8 sps:$4 sm:$0xff]  }
   0xd   :  { %567 = vmatpush1.bf16.msra.mxu1 %v756_v21  ;;  %v766_v34 = vld [vmem:[%s1076_s2 + $0x54] ss:$8 sps:$4 sm:$0xff]   ;;  %v768_v36 = vld [vmem:[%s1076_s2 + $0x50] ss:$8 sps:$4 sm:$0xff]   ;;  %v769_v38 = vld [vmem:[%s1076_s2 + $0x64] ss:$8 sps:$4 sm:$0xff]  }
   0xe   :  { %568 = vmatprep.subr.bf16.mxu1 %v757_v22  ;;  %v735_v39 = vld [vmem:[%s1074_s1 + $0xc0] ss:$8 sps:$4 sm:$0xff]   ;;  %v736_v41 = vld [vmem:[%s1074_s1 + $0xd4] ss:$8 sps:$4 sm:$0xff]   ;;  %v738_v43 = vld [vmem:[%s1074_s1 + $0xd0] ss:$8 sps:$4 sm:$0xff]  }
   0xf   :  { %240 = vmatpush1.bf16.msra.mxu0 %v708_v7  ;;  %v771_v40 = vld [vmem:[%s1076_s2 + $0x60] ss:$8 sps:$4 sm:$0xff]   ;;  %v772_v42 = vld [vmem:[%s1076_s2 + $0x74] ss:$8 sps:$4 sm:$0xff]   ;;  %v774_v44 = vld [vmem:[%s1076_s2 + $0x70] ss:$8 sps:$4 sm:$0xff]  }
  0x10   :  { %241 = vmatprep.subr.bf16.mxu0 %v709_v8  ;;  %v739_v45 = vld [vmem:[%s1074_s1 + $0xe4] ss:$8 sps:$4 sm:$0xff]   ;;  %v741_v46 = vld [vmem:[%s1074_s1 + $0xe0] ss:$8 sps:$4 sm:$0xff]   ;;  %v742_v47 = vld [vmem:[%s1074_s1 + $0xf4] ss:$8 sps:$4 sm:$0xff]  }
  0x11   :  { %569 = vmatpush1.bf16.msra.mxu1 %v759_v25  ;;  %v744_v48 = vld [vmem:[%s1074_s1 + $0xf0] ss:$8 sps:$4 sm:$0xff]   ;;  %v745_v49 = vld [vmem:[%s1075_s0] ss:$8 sps:$4 sm:$0xff]   ;;  %v748_v50 = vld [vmem:[%s1075_s0 + $0x14] ss:$8 sps:$4 sm:$0xff]  }
  0x12   :  { %570 = vmatprep.subr.bf16.mxu1 %v760_v26  ;;  %v750_v51 = vld [vmem:[%s1075_s0 + $0x10] ss:$8 sps:$4 sm:$0xff]   ;;  %v775_v52 = vld [vmem:[%s1076_s2 + $0x84] ss:$8 sps:$4 sm:$0xff]   ;;  %v777_v53 = vld [vmem:[%s1076_s2 + $0x80] ss:$8 sps:$4 sm:$0xff]  }
  0x13   :  { %242 = vmatpush1.bf16.msra.mxu0 %v711_v9  ;;  %v778_v54 = vld [vmem:[%s1076_s2 + $0x94] ss:$8 sps:$4 sm:$0xff]   ;;  %v780_v55 = vld [vmem:[%s1076_s2 + $0x90] ss:$8 sps:$4 sm:$0xff]   ;;  %v781_v56 = vld [vmem:[%s1076_s2 + $0xa4] ss:$8 sps:$4 sm:$0xff]  }
  0x14   :  { %243 = vmatprep.subr.bf16.mxu0 %v712_v10  ;;  %v783_v57 = vld [vmem:[%s1076_s2 + $0xa0] ss:$8 sps:$4 sm:$0xff]   ;;  %v784_v58 = vld [vmem:[%s1076_s2 + $0xb4] ss:$8 sps:$4 sm:$0xff]   ;;  %v786_v59 = vld [vmem:[%s1076_s2 + $0xb0] ss:$8 sps:$4 sm:$0xff]  }
  0x15   :  { %571 = vmatpush1.bf16.msra.mxu1 %v762_v29  ;;  %v787_v60 = vld [vmem:[%s1076_s2 + $0xc4] ss:$8 sps:$4 sm:$0xff]   ;;  %v789_v61 = vld [vmem:[%s1076_s2 + $0xc0] ss:$8 sps:$4 sm:$0xff]   ;;  %v790_v62 = vld [vmem:[%s1076_s2 + $0xd4] ss:$8 sps:$4 sm:$0xff]  }
  0x16   :  { %572 = vmatprep.subr.bf16.mxu1 %v763_v30  ;;  %v792_v63 = vld [vmem:[%s1076_s2 + $0xd0] ss:$8 sps:$4 sm:$0xff]   ;;  %v793_v0 = vld [vmem:[%s1076_s2 + $0xe4] ss:$8 sps:$4 sm:$0xff]   ;;  %v795_v1 = vld [vmem:[%s1076_s2 + $0xe0] ss:$8 sps:$4 sm:$0xff]  }
  0x17   :  { %244 = vmatpush1.bf16.msra.mxu0 %v714_v11  ;;  %v796_v2 = vld [vmem:[%s1076_s2 + $0xf4] ss:$8 sps:$4 sm:$0xff]   ;;  %v798_v3 = vld [vmem:[%s1076_s2 + $0xf0] ss:$8 sps:$4 sm:$0xff]  }
  0x18   :  { %245 = vmatprep.subr.bf16.mxu0 %v715_v12 }
  0x19   :  { %573 = vmatpush1.bf16.msra.mxu1 %v765_v32 }
  0x1a   :  { %574 = vmatprep.subr.bf16.mxu1 %v766_v34 }
  0x1b   :  { %246 = vmatpush1.bf16.msra.mxu0 %v717_v14 }
  0x1c   :  { %247 = vmatprep.subr.bf16.mxu0 %v718_v15 }
  0x1d   :  { %575 = vmatpush1.bf16.msra.mxu1 %v768_v36 }
  0x1e   :  { %576 = vmatprep.subr.bf16.mxu1 %v769_v38 }
  0x1f   :  { %248 = vmatpush1.bf16.msra.mxu0 %v720_v18 }
  0x20   :  { %249 = vmatprep.subr.bf16.mxu0 %v721_v20 }
  0x21   :  { %577 = vmatpush1.bf16.msra.mxu1 %v771_v40 }
  0x22   :  { %578 = vmatprep.subr.bf16.mxu1 %v772_v42 }
  0x23   :  { %250 = vmatpush1.bf16.msra.mxu0 %v723_v23 }
  0x24   :  { %251 = vmatprep.subr.bf16.mxu0 %v724_v24 }
  0x25   :  { %579 = vmatpush1.bf16.msra.mxu1 %v774_v44 }
  0x26   :  { %580 = vmatprep.subr.bf16.mxu1 %v775_v52 }
  0x27   :  { %252 = vmatpush1.bf16.msra.mxu0 %v726_v27 }
  0x28   :  { %253 = vmatprep.subr.bf16.mxu0 %v727_v28 }
  0x29   :  { %581 = vmatpush1.bf16.msra.mxu1 %v777_v53 }
  0x2a   :  { %582 = vmatprep.subr.bf16.mxu1 %v778_v54 }
  0x2b   :  { %254 = vmatpush1.bf16.msra.mxu0 %v729_v31 }
  0x2c   :  { %255 = vmatprep.subr.bf16.mxu0 %v730_v33 }
  0x2d   :  { %583 = vmatpush1.bf16.msra.mxu1 %v780_v55 }
  0x2e   :  { %584 = vmatprep.subr.bf16.mxu1 %v781_v56 }
  0x2f   :  { %256 = vmatpush1.bf16.msra.mxu0 %v732_v35 }
  0x30   :  { %257 = vmatprep.subr.bf16.mxu0 %v733_v37 }
  0x31   :  { %585 = vmatpush1.bf16.msra.mxu1 %v783_v57 }
  0x32   :  { %586 = vmatprep.subr.bf16.mxu1 %v784_v58 }
  0x33   :  { %258 = vmatpush1.bf16.msra.mxu0 %v735_v39 }
  0x34   :  { %259 = vmatprep.subr.bf16.mxu0 %v736_v41 }
  0x35   :  { %587 = vmatpush1.bf16.msra.mxu1 %v786_v59 }
  0x36   :  { %588 = vmatprep.subr.bf16.mxu1 %v787_v60 }
  0x37   :  { %260 = vmatpush1.bf16.msra.mxu0 %v738_v43 }
  0x38   :  { %261 = vmatprep.subr.bf16.mxu0 %v739_v45 }
  0x39   :  { %589 = vmatpush1.bf16.msra.mxu1 %v789_v61 }
  0x3a   :  { %590 = vmatprep.subr.bf16.mxu1 %v790_v62 }
  0x3b   :  { %262 = vmatpush1.bf16.msra.mxu0 %v741_v46 }
  0x3c   :  { %263 = vmatprep.subr.bf16.mxu0 %v742_v47 }
  0x3d   :  { %591 = vmatpush1.bf16.msra.mxu1 %v792_v63 }
  0x3e   :  { %592 = vmatprep.subr.bf16.mxu1 %v793_v0 }
  0x3f   :  { %264 = vmatpush1.bf16.msra.mxu0 %v744_v48 }
  0x41   :  { %593 = vmatpush1.bf16.msra.mxu1 %v795_v1 }
  0x42   :  { %266 = vmatmul.mubr.bf16.vlgmr.msra.gmra.mrb[0].mxu0 %v745_v49  ;;  %594 = vmatprep.subr.bf16.mxu1 %v796_v2 }
  0x43   :  { %275 = vmatprep.mubr.bf16.mxu0 %v748_v50 }
  0x45   :  { %595 = vmatpush1.bf16.msra.mxu1 %v798_v3 }
  0x4a   :  { %276 = vmatmul.mubr.bf16.gmra.mrb[4].mxu0 %v750_v51 }
 0x115   :  { %v267_v4 = vpop.f32.mrb[0].mxu0 }
 0x116   :  { %v294_v5 = vmul.f32 %v267_v4, %v267_v4  ;;  %v269_v6 = vpop.f32.mrb[1].mxu0  ;;  %v286_v56 = vmul.f32 0.5, %v267_v4 }
 0x117   :  { %v295_v7 = vmul.f32 %v269_v6, %v269_v6  ;;  %v271_v8 = vpop.f32.mrb[2].mxu0  ;;  %v287_v60 = vmul.f32 0.5, %v269_v6 }
 0x118   :  { %v302_v9 = vmul.f32 %v294_v5, %v267_v4  ;;  %v296_v10 = vmul.f32 %v271_v8, %v271_v8  ;;  %v273_v11 = vpop.f32.mrb[3].mxu0  ;;  %v288_v57 = vmul.f32 0.5, %v271_v8 }
 0x119   :  { %v303_v12 = vmul.f32 %v295_v7, %v269_v6  ;;  %v297_v13 = vmul.f32 %v273_v11, %v273_v11  ;;  %v289_v62 = vmul.f32 0.5, %v273_v11 }
 0x11a   :  { %v310_v14 = vmul.f32 0.044715, %v302_v9  ;;  %v304_v15 = vmul.f32 %v296_v10, %v271_v8 }
 0x11b   :  { %v311_v16 = vmul.f32 0.044715, %v303_v12  ;;  %v305_v17 = vmul.f32 %v297_v13, %v273_v11 }
 0x11c   :  { %v318_v18 = vadd.f32 %v310_v14, %v267_v4  ;;  %v312_v19 = vmul.f32 0.044715, %v304_v15 }
 0x11d   :  { %v319_v20 = vadd.f32 %v311_v16, %v269_v6  ;;  %v313_v21 = vmul.f32 0.044715, %v305_v17  ;;  %v277_v22 = vpop.f32.mrb[4].mxu0 }
 0x11e   :  { %v326_v23 = vmul.f32 0.7978846, %v318_v18  ;;  %v320_v24 = vadd.f32 %v312_v19, %v271_v8  ;;  %v298_v25 = vmul.f32 %v277_v22, %v277_v22  ;;  %v279_v26 = vpop.f32.mrb[5].mxu0  ;;  %v290_v8 = vmul.f32 0.5, %v277_v22 }
 0x11f   :  { %v327_v27 = vmul.f32 0.7978846, %v319_v20  ;;  %v321_v28 = vadd.f32 %v313_v21, %v273_v11  ;;  %v299_v29 = vmul.f32 %v279_v26, %v279_v26  ;;  %v281_v30 = vpop.f32.mrb[6].mxu0  ;;  %v291_v16 = vmul.f32 0.5, %v279_v26 }
 0x120   :  { %799 = vtanh.f32 %v326_v23  ;;  %v328_v31 = vmul.f32 0.7978846, %v320_v24  ;;  %v306_v32 = vmul.f32 %v298_v25, %v277_v22  ;;  %v283_v33 = vpop.f32.mrb[7].mxu0  ;;  %v300_v36 = vmul.f32 %v281_v30, %v281_v30 }
 0x121   :  { %v329_v34 = vmul.f32 0.7978846, %v321_v28  ;;  %v307_v35 = vmul.f32 %v299_v29, %v279_v26  ;;  %v301_v38 = vmul.f32 %v283_v33, %v283_v33  ;;  %v292_v15 = vmul.f32 0.5, %v281_v30 }
 0x122   :  { %801 = vtanh.f32 %v328_v31  ;;  %v314_v37 = vmul.f32 0.044715, %v306_v32  ;;  %v308_v40 = vmul.f32 %v300_v36, %v281_v30  ;;  %v293_v11 = vmul.f32 0.5, %v283_v33 }
 0x123   :  { %v315_v39 = vmul.f32 0.044715, %v307_v35  ;;  %803 = vtanh.f32 %v327_v27  ;;  %v309_v42 = vmul.f32 %v301_v38, %v283_v33  ;;  %v396_v25 = vlaneseq }
 0x124   :  { %v322_v41 = vadd.f32 %v314_v37, %v277_v22  ;;  %805 = vtanh.f32 %v329_v34  ;;  %v316_v44 = vmul.f32 0.044715, %v308_v40  ;;  %v394_v22 = vld [vmem:[%s1077_s3] sm:$0xff] }
 0x125   :  { %v323_v43 = vadd.f32 %v315_v39, %v279_v26  ;;  %v317_v46 = vmul.f32 0.044715, %v309_v42  ;;  %v397_v27 = vshrl.u32 %v396_v25, 7  ;;  %v395_v26 = vld [vmem:[%s1077_s3 + $0x8] sm:$0xff] }
 0x126   :  { %v330_v45 = vmul.f32 0.7978846, %v322_v41  ;;  %v324_v48 = vadd.f32 %v316_v44, %v281_v30 }
 0x127   :  { %v331_v47 = vmul.f32 0.7978846, %v323_v43  ;;  %v325_v49 = vadd.f32 %v317_v46, %v283_v33  ;;  %v398_v28 = vsub.s32 0, %v397_v27 }
 0x128   :  { %807 = vtanh.f32 %v330_v45  ;;  %v332_v50 = vmul.f32 0.7978846, %v324_v48 }
 0x129   :  { %809 = vtanh.f32 %v331_v47  ;;  %v333_v52 = vmul.f32 0.7978846, %v325_v49  ;;  %v399_v29 = vrot.slane %v394_v22, %v398_v28  ;;  %v403_v30 = vrot.slane %v395_v26, %v398_v28 }
 0x12a   :  { %v800_v51 = vpop.eup %799  ;;  %811 = vtanh.f32 %v332_v50 }
 0x12b   :  { %v342_v53 = vadd.f32 1.0, %v800_v51  ;;  %813 = vtanh.f32 %v333_v52 }
 0x12c   :  { %v802_v54 = vpop.eup %801 }
 0x12d   :  { %v804_v55 = vpop.eup %803  ;;  %v344_v58 = vadd.f32 1.0, %v802_v54  ;;  %v350_v0 = vmul.f32 %v342_v53, %v286_v56 }
 0x12e   :  { %v806_v59 = vpop.eup %805  ;;  %v343_v61 = vadd.f32 1.0, %v804_v55 }
 0x12f   :  { %v345_v63 = vadd.f32 1.0, %v806_v59  ;;  %v352_v1 = vmul.f32 %v344_v58, %v288_v57 }
 0x130   :  { %v351_v2 = vmul.f32 %v343_v61, %v287_v60 }
 0x131   :  { %v353_v3 = vmul.f32 %v345_v63, %v289_v62  ;;  %v358_v5 = vpack.c.bf16 %v352_v1, %v350_v0 }
 0x132   :  { %v808_v7 = vpop.eup %807 }
 0x133   :  { %v810_v9 = vpop.eup %809  ;;  %v359_v10 = vpack.c.bf16 %v353_v3, %v351_v2  ;;  %v346_v12 = vadd.f32 1.0, %v808_v7 }
 0x134   :  { %v812_v13 = vpop.eup %811  ;;  %v347_v14 = vadd.f32 1.0, %v810_v9 }
 0x135   :  { %596 = vmatprep.mubr.bf16.mxu1 %v359_v10  ;;  %v814_v4 = vpop.eup %813  ;;  %v348_v6 = vadd.f32 1.0, %v812_v13  ;;  %v354_v18 = vmul.f32 %v346_v12, %v290_v8 }
 0x136   :  { %597 = vmatmul.mubr.bf16.vlgmr.msra.gmra.mrb[0].mxu1 %v358_v5  ;;  %v349_v17 = vadd.f32 1.0, %v814_v4  ;;  %v355_v21 = vmul.f32 %v347_v14, %v291_v16 }
 0x137   :  { %v356_v19 = vmul.f32 %v348_v6, %v292_v15 }
 0x138   :  { %v357_v20 = vmul.f32 %v349_v17, %v293_v11 }
 0x139   :  { %v360_v23 = vpack.c.bf16 %v356_v19, %v354_v18 }
 0x13a   :  { %v361_v24 = vpack.c.bf16 %v357_v20, %v355_v21 }
 0x13c   :  { %606 = vmatprep.mubr.bf16.mxu1 %v361_v24 }
 0x13e   :  { %607 = vmatmul.mubr.bf16.gmra.mrb[4].mxu1 %v360_v23 }
 0x209   :  { %v598_v31 = vpop.f32.mrb[0].mxu1 }
 0x20a   :  { %v599_v32 = vadd.f32 %v598_v31, %v399_v29  ;;  %v600_v33 = vpop.f32.mrb[1].mxu1 }
 0x20b   :  { %v601_v34 = vadd.f32 %v600_v33, %v403_v30  ;;  %v602_v35 = vpop.f32.mrb[2].mxu1 }
 0x20c   :  { %617 = vst [vmem:[%s1078_s4] sm:$0xff] %v599_v32  ;;  %v603_v36 = vadd.f32 %v602_v35, %v399_v29  ;;  %v604_v37 = vpop.f32.mrb[3].mxu1 }
 0x20d   :  { %618 = vst [vmem:[%s1078_s4 + $0x8] sm:$0xff] %v601_v34  ;;  %v605_v38 = vadd.f32 %v604_v37, %v403_v30 }
 0x20e   :  { %619 = vst [vmem:[%s1078_s4 + $0x10] sm:$0xff] %v603_v36 }
 0x20f   :  { %620 = vst [vmem:[%s1078_s4 + $0x18] sm:$0xff] %v605_v38 }
 0x211   :  { %v608_v39 = vpop.f32.mrb[4].mxu1 }
 0x212   :  { %v609_v40 = vadd.f32 %v608_v39, %v399_v29  ;;  %v610_v41 = vpop.f32.mrb[5].mxu1 }
 0x213   :  { %v611_v42 = vadd.f32 %v610_v41, %v403_v30  ;;  %v612_v43 = vpop.f32.mrb[6].mxu1 }
 0x214   :  { %621 = vst [vmem:[%s1078_s4 + $0x20] sm:$0xff] %v609_v40  ;;  %v613_v44 = vadd.f32 %v612_v43, %v399_v29  ;;  %v614_v45 = vpop.f32.mrb[7].mxu1 }
 0x215   :  { %622 = vst [vmem:[%s1078_s4 + $0x28] sm:$0xff] %v611_v42  ;;  %v615_v46 = vadd.f32 %v614_v45, %v403_v30 }
 0x216   :  { %623 = vst [vmem:[%s1078_s4 + $0x30] sm:$0xff] %v613_v44 }
 0x217   :  { %624 = vst [vmem:[%s1078_s4 + $0x38] sm:$0xff] %v615_v46 }

// kernel: state_space_2d_forward.2
= control target key start
LH: loop header
LB: loop body
LE: loop exit
PB: predicated region body
PF: predicated region fallthrough
CT: control target
= control target key end

     0   :  { %s1080_s1 = inlined_call_operand.vmem [shape: bf16[256,256], index: 1, kind: input, shape index: {}]   ;;  %s1081_s0 = inlined_call_operand.vmem [shape: f32[32,256], index: 0, kind: input, shape index: {}]   ;;  %s1082_s2 = inlined_call_operand.vmem [shape: bf16[256,256], index: 2, kind: input, shape index: {}]   ;;  %s1083_s3 = inlined_call_operand.vmem [shape: f32[8,256], index: 3, kind: input, shape index: {}]   ;;  %s1084_s4 = inlined_call_operand.vmem [shape: bf16[32,256], index: 4, kind: output, shape index: {}]  }
   0x1   :  { %v709_v0 = vld [vmem:[%s1080_s1 + $0x4] ss:$8 sps:$4 sm:$0xff]   ;;  %v711_v1 = vld [vmem:[%s1080_s1] ss:$8 sps:$4 sm:$0xff]   ;;  %v712_v2 = vld [vmem:[%s1080_s1 + $0x14] ss:$8 sps:$4 sm:$0xff]  }
   0x2   :  { %221 = vmatprep.subr.bf16.mxu0 %v709_v0  ;;  %v714_v3 = vld [vmem:[%s1080_s1 + $0x10] ss:$8 sps:$4 sm:$0xff]   ;;  %v715_v4 = vld [vmem:[%s1080_s1 + $0x24] ss:$8 sps:$4 sm:$0xff]   ;;  %v717_v5 = vld [vmem:[%s1080_s1 + $0x20] ss:$8 sps:$4 sm:$0xff]  }
   0x3   :  { %222 = vmatpush1.bf16.msra.mxu0 %v711_v1  ;;  %v718_v6 = vld [vmem:[%s1080_s1 + $0x34] ss:$8 sps:$4 sm:$0xff]   ;;  %v720_v7 = vld [vmem:[%s1080_s1 + $0x30] ss:$8 sps:$4 sm:$0xff]   ;;  %v721_v8 = vld [vmem:[%s1080_s1 + $0x44] ss:$8 sps:$4 sm:$0xff]  }
   0x4   :  { %223 = vmatprep.subr.bf16.mxu0 %v712_v2  ;;  %v723_v9 = vld [vmem:[%s1080_s1 + $0x40] ss:$8 sps:$4 sm:$0xff]   ;;  %v724_v10 = vld [vmem:[%s1080_s1 + $0x54] ss:$8 sps:$4 sm:$0xff]   ;;  %v726_v11 = vld [vmem:[%s1080_s1 + $0x50] ss:$8 sps:$4 sm:$0xff]  }
   0x5   :  { %v727_v12 = vld [vmem:[%s1080_s1 + $0x64] ss:$8 sps:$4 sm:$0xff]   ;;  %v20_v14 = vld [vmem:[%s1081_s0 + $0x18] sm:$0xff]  ;;  %v729_v16 = vld [vmem:[%s1080_s1 + $0x60] ss:$8 sps:$4 sm:$0xff]  }
   0x6   :  { %v18_v13 = vld [vmem:[%s1081_s0 + $0x8] sm:$0xff]  ;;  %v730_v17 = vld [vmem:[%s1080_s1 + $0x74] ss:$8 sps:$4 sm:$0xff]   ;;  %v732_v20 = vld [vmem:[%s1080_s1 + $0x70] ss:$8 sps:$4 sm:$0xff]  }
   0x7   :  { %224 = vmatpush1.bf16.msra.mxu0 %v714_v3  ;;  %v26_v15 = vpack.c.bf16 %v20_v14, %v18_v13  ;;  %v757_v18 = vld [vmem:[%s1082_s2 + $0x4] ss:$8 sps:$4 sm:$0xff]   ;;  %v759_v19 = vld [vmem:[%s1082_s2] ss:$8 sps:$4 sm:$0xff]   ;;  %v760_v21 = vld [vmem:[%s1082_s2 + $0x14] ss:$8 sps:$4 sm:$0xff]  }
   0x8   :  { %225 = vmatprep.subr.bf16.mxu0 %v715_v4  ;;  %552 = vmatprep.subr.bf16.mxu1 %v757_v18  ;;  %v733_v22 = vld [vmem:[%s1080_s1 + $0x84] ss:$8 sps:$4 sm:$0xff]   ;;  %v762_v23 = vld [vmem:[%s1082_s2 + $0x10] ss:$8 sps:$4 sm:$0xff]   ;;  %v735_v25 = vld [vmem:[%s1080_s1 + $0x80] ss:$8 sps:$4 sm:$0xff]  }
   0x9   :  { %253 = vmatprep.mubr.bf16.mxu0 %v26_v15  ;;  %553 = vmatpush1.bf16.msra.mxu1 %v759_v19  ;;  %v763_v24 = vld [vmem:[%s1082_s2 + $0x24] ss:$8 sps:$4 sm:$0xff]   ;;  %v736_v26 = vld [vmem:[%s1080_s1 + $0x94] ss:$8 sps:$4 sm:$0xff]   ;;  %v765_v27 = vld [vmem:[%s1082_s2 + $0x20] ss:$8 sps:$4 sm:$0xff]  }
   0xa   :  { %554 = vmatprep.subr.bf16.mxu1 %v760_v21  ;;  %v766_v28 = vld [vmem:[%s1082_s2 + $0x34] ss:$8 sps:$4 sm:$0xff]   ;;  %v738_v29 = vld [vmem:[%s1080_s1 + $0x90] ss:$8 sps:$4 sm:$0xff]   ;;  %v739_v30 = vld [vmem:[%s1080_s1 + $0xa4] ss:$8 sps:$4 sm:$0xff]  }
   0xb   :  { %226 = vmatpush1.bf16.msra.mxu0 %v717_v5  ;;  %v768_v31 = vld [vmem:[%s1082_s2 + $0x30] ss:$8 sps:$4 sm:$0xff]   ;;  %v769_v32 = vld [vmem:[%s1082_s2 + $0x44] ss:$8 sps:$4 sm:$0xff]   ;;  %v741_v33 = vld [vmem:[%s1080_s1 + $0xa0] ss:$8 sps:$4 sm:$0xff]  }
   0xc   :  { %227 = vmatprep.subr.bf16.mxu0 %v718_v6  ;;  %v771_v34 = vld [vmem:[%s1082_s2 + $0x40] ss:$8 sps:$4 sm:$0xff]   ;;  %v742_v35 = vld [vmem:[%s1080_s1 + $0xb4] ss:$8 sps:$4 sm:$0xff]   ;;  %v744_v37 = vld [vmem:[%s1080_s1 + $0xb0] ss:$8 sps:$4 sm:$0xff]  }
   0xd   :  { %555 = vmatpush1.bf16.msra.mxu1 %v762_v23  ;;  %v772_v36 = vld [vmem:[%s1082_s2 + $0x54] ss:$8 sps:$4 sm:$0xff]   ;;  %v774_v38 = vld [vmem:[%s1082_s2 + $0x50] ss:$8 sps:$4 sm:$0xff]   ;;  %v745_v39 = vld [vmem:[%s1080_s1 + $0xc4] ss:$8 sps:$4 sm:$0xff]  }
   0xe   :  { %556 = vmatprep.subr.bf16.mxu1 %v763_v24  ;;  %v775_v40 = vld [vmem:[%s1082_s2 + $0x64] ss:$8 sps:$4 sm:$0xff]   ;;  %v747_v41 = vld [vmem:[%s1080_s1 + $0xc0] ss:$8 sps:$4 sm:$0xff]   ;;  %v748_v43 = vld [vmem:[%s1080_s1 + $0xd4] ss:$8 sps:$4 sm:$0xff]  }
   0xf   :  { %228 = vmatpush1.bf16.msra.mxu0 %v720_v7  ;;  %v777_v42 = vld [vmem:[%s1082_s2 + $0x60] ss:$8 sps:$4 sm:$0xff]   ;;  %v778_v44 = vld [vmem:[%s1082_s2 + $0x74] ss:$8 sps:$4 sm:$0xff]   ;;  %v750_v45 = vld [vmem:[%s1080_s1 + $0xd0] ss:$8 sps:$4 sm:$0xff]  }
  0x10   :  { %229 = vmatprep.subr.bf16.mxu0 %v721_v8  ;;  %v780_v46 = vld [vmem:[%s1082_s2 + $0x70] ss:$8 sps:$4 sm:$0xff]   ;;  %v751_v47 = vld [vmem:[%s1080_s1 + $0xe4] ss:$8 sps:$4 sm:$0xff]   ;;  %v753_v48 = vld [vmem:[%s1080_s1 + $0xe0] ss:$8 sps:$4 sm:$0xff]  }
  0x11   :  { %557 = vmatpush1.bf16.msra.mxu1 %v765_v27  ;;  %v754_v49 = vld [vmem:[%s1080_s1 + $0xf4] ss:$8 sps:$4 sm:$0xff]   ;;  %v756_v50 = vld [vmem:[%s1080_s1 + $0xf0] ss:$8 sps:$4 sm:$0xff]   ;;  %v17_v51 = vld [vmem:[%s1081_s0] sm:$0xff] }
  0x12   :  { %558 = vmatprep.subr.bf16.mxu1 %v766_v28  ;;  %v19_v52 = vld [vmem:[%s1081_s0 + $0x10] sm:$0xff]  ;;  %v22_v53 = vld [vmem:[%s1081_s0 + $0x28] sm:$0xff]  ;;  %v24_v54 = vld [vmem:[%s1081_s0 + $0x38] sm:$0xff] }
  0x13   :  { %230 = vmatpush1.bf16.msra.mxu0 %v723_v9  ;;  %v25_v55 = vpack.c.bf16 %v19_v52, %v17_v51  ;;  %v28_v56 = vpack.c.bf16 %v24_v54, %v22_v53  ;;  %v21_v57 = vld [vmem:[%s1081_s0 + $0x20] sm:$0xff]  ;;  %v23_v58 = vld [vmem:[%s1081_s0 + $0x30] sm:$0xff] }
  0x14   :  { %231 = vmatprep.subr.bf16.mxu0 %v724_v10  ;;  %v27_v59 = vpack.c.bf16 %v23_v58, %v21_v57  ;;  %v781_v60 = vld [vmem:[%s1082_s2 + $0x84] ss:$8 sps:$4 sm:$0xff]   ;;  %v783_v61 = vld [vmem:[%s1082_s2 + $0x80] ss:$8 sps:$4 sm:$0xff]   ;;  %v784_v62 = vld [vmem:[%s1082_s2 + $0x94] ss:$8 sps:$4 sm:$0xff]  }
  0x15   :  { %559 = vmatpush1.bf16.msra.mxu1 %v768_v31  ;;  %v786_v63 = vld [vmem:[%s1082_s2 + $0x90] ss:$8 sps:$4 sm:$0xff]   ;;  %v787_v0 = vld [vmem:[%s1082_s2 + $0xa4] ss:$8 sps:$4 sm:$0xff]   ;;  %v789_v1 = vld [vmem:[%s1082_s2 + $0xa0] ss:$8 sps:$4 sm:$0xff]  }
  0x16   :  { %560 = vmatprep.subr.bf16.mxu1 %v769_v32  ;;  %v790_v2 = vld [vmem:[%s1082_s2 + $0xb4] ss:$8 sps:$4 sm:$0xff]   ;;  %v792_v3 = vld [vmem:[%s1082_s2 + $0xb0] ss:$8 sps:$4 sm:$0xff]   ;;  %v793_v4 = vld [vmem:[%s1082_s2 + $0xc4] ss:$8 sps:$4 sm:$0xff]  }
  0x17   :  { %232 = vmatpush1.bf16.msra.mxu0 %v726_v11  ;;  %v795_v5 = vld [vmem:[%s1082_s2 + $0xc0] ss:$8 sps:$4 sm:$0xff]   ;;  %v796_v6 = vld [vmem:[%s1082_s2 + $0xd4] ss:$8 sps:$4 sm:$0xff]   ;;  %v798_v7 = vld [vmem:[%s1082_s2 + $0xd0] ss:$8 sps:$4 sm:$0xff]  }
  0x18   :  { %233 = vmatprep.subr.bf16.mxu0 %v727_v12  ;;  %v799_v8 = vld [vmem:[%s1082_s2 + $0xe4] ss:$8 sps:$4 sm:$0xff]   ;;  %v801_v9 = vld [vmem:[%s1082_s2 + $0xe0] ss:$8 sps:$4 sm:$0xff]   ;;  %v802_v10 = vld [vmem:[%s1082_s2 + $0xf4] ss:$8 sps:$4 sm:$0xff]  }
  0x19   :  { %561 = vmatpush1.bf16.msra.mxu1 %v771_v34  ;;  %v804_v11 = vld [vmem:[%s1082_s2 + $0xf0] ss:$8 sps:$4 sm:$0xff]  }
  0x1a   :  { %562 = vmatprep.subr.bf16.mxu1 %v772_v36 }
  0x1b   :  { %234 = vmatpush1.bf16.msra.mxu0 %v729_v16 }
  0x1c   :  { %235 = vmatprep.subr.bf16.mxu0 %v730_v17 }
  0x1d   :  { %563 = vmatpush1.bf16.msra.mxu1 %v774_v38 }
  0x1e   :  { %564 = vmatprep.subr.bf16.mxu1 %v775_v40 }
  0x1f   :  { %236 = vmatpush1.bf16.msra.mxu0 %v732_v20 }
  0x20   :  { %237 = vmatprep.subr.bf16.mxu0 %v733_v22 }
  0x21   :  { %565 = vmatpush1.bf16.msra.mxu1 %v777_v42 }
  0x22   :  { %566 = vmatprep.subr.bf16.mxu1 %v778_v44 }
  0x23   :  { %238 = vmatpush1.bf16.msra.mxu0 %v735_v25 }
  0x24   :  { %239 = vmatprep.subr.bf16.mxu0 %v736_v26 }
  0x25   :  { %567 = vmatpush1.bf16.msra.mxu1 %v780_v46 }
  0x26   :  { %568 = vmatprep.subr.bf16.mxu1 %v781_v60 }
  0x27   :  { %240 = vmatpush1.bf16.msra.mxu0 %v738_v29 }
  0x28   :  { %241 = vmatprep.subr.bf16.mxu0 %v739_v30 }
  0x29   :  { %569 = vmatpush1.bf16.msra.mxu1 %v783_v61 }
  0x2a   :  { %570 = vmatprep.subr.bf16.mxu1 %v784_v62 }
  0x2b   :  { %242 = vmatpush1.bf16.msra.mxu0 %v741_v33 }
  0x2c   :  { %243 = vmatprep.subr.bf16.mxu0 %v742_v35 }
  0x2d   :  { %571 = vmatpush1.bf16.msra.mxu1 %v786_v63 }
  0x2e   :  { %572 = vmatprep.subr.bf16.mxu1 %v787_v0 }
  0x2f   :  { %244 = vmatpush1.bf16.msra.mxu0 %v744_v37 }
  0x30   :  { %245 = vmatprep.subr.bf16.mxu0 %v745_v39 }
  0x31   :  { %573 = vmatpush1.bf16.msra.mxu1 %v789_v1 }
  0x32   :  { %574 = vmatprep.subr.bf16.mxu1 %v790_v2 }
  0x33   :  { %246 = vmatpush1.bf16.msra.mxu0 %v747_v41 }
  0x34   :  { %247 = vmatprep.subr.bf16.mxu0 %v748_v43 }
  0x35   :  { %575 = vmatpush1.bf16.msra.mxu1 %v792_v3 }
  0x36   :  { %576 = vmatprep.subr.bf16.mxu1 %v793_v4 }
  0x37   :  { %248 = vmatpush1.bf16.msra.mxu0 %v750_v45 }
  0x38   :  { %249 = vmatprep.subr.bf16.mxu0 %v751_v47 }
  0x39   :  { %577 = vmatpush1.bf16.msra.mxu1 %v795_v5 }
  0x3a   :  { %578 = vmatprep.subr.bf16.mxu1 %v796_v6 }
  0x3b   :  { %250 = vmatpush1.bf16.msra.mxu0 %v753_v48 }
  0x3c   :  { %251 = vmatprep.subr.bf16.mxu0 %v754_v49 }
  0x3d   :  { %579 = vmatpush1.bf16.msra.mxu1 %v798_v7 }
  0x3e   :  { %580 = vmatprep.subr.bf16.mxu1 %v799_v8 }
  0x3f   :  { %252 = vmatpush1.bf16.msra.mxu0 %v756_v50 }
  0x41   :  { %581 = vmatpush1.bf16.msra.mxu1 %v801_v9 }
  0x42   :  { %254 = vmatmul.mubr.bf16.vlgmr.msra.gmra.mrb[0].mxu0 %v25_v55  ;;  %582 = vmatprep.subr.bf16.mxu1 %v802_v10 }
  0x43   :  { %263 = vmatprep.mubr.bf16.mxu0 %v28_v56 }
  0x45   :  { %583 = vmatpush1.bf16.msra.mxu1 %v804_v11 }
  0x4a   :  { %264 = vmatmul.mubr.bf16.gmra.mrb[4].mxu0 %v27_v59 }
 0x115   :  { %v255_v12 = vpop.f32.mrb[0].mxu0 }
 0x116   :  { %v282_v13 = vmul.f32 %v255_v12, %v255_v12  ;;  %v257_v14 = vpop.f32.mrb[1].mxu0  ;;  %v274_v0 = vmul.f32 0.5, %v255_v12 }
 0x117   :  { %v283_v15 = vmul.f32 %v257_v14, %v257_v14  ;;  %v259_v16 = vpop.f32.mrb[2].mxu0  ;;  %v275_v4 = vmul.f32 0.5, %v257_v14 }
 0x118   :  { %v290_v17 = vmul.f32 %v282_v13, %v255_v12  ;;  %v284_v18 = vmul.f32 %v259_v16, %v259_v16  ;;  %v261_v19 = vpop.f32.mrb[3].mxu0  ;;  %v276_v1 = vmul.f32 0.5, %v259_v16 }
 0x119   :  { %v291_v20 = vmul.f32 %v283_v15, %v257_v14  ;;  %v285_v21 = vmul.f32 %v261_v19, %v261_v19  ;;  %v277_v6 = vmul.f32 0.5, %v261_v19 }
 0x11a   :  { %v298_v22 = vmul.f32 0.044715, %v290_v17  ;;  %v292_v23 = vmul.f32 %v284_v18, %v259_v16 }
 0x11b   :  { %v299_v24 = vmul.f32 0.044715, %v291_v20  ;;  %v293_v25 = vmul.f32 %v285_v21, %v261_v19 }
 0x11c   :  { %v306_v26 = vadd.f32 %v298_v22, %v255_v12  ;;  %v300_v27 = vmul.f32 0.044715, %v292_v23 }
 0x11d   :  { %v307_v28 = vadd.f32 %v299_v24, %v257_v14  ;;  %v301_v29 = vmul.f32 0.044715, %v293_v25  ;;  %v265_v30 = vpop.f32.mrb[4].mxu0 }
 0x11e   :  { %v314_v31 = vmul.f32 0.7978846, %v306_v26  ;;  %v308_v32 = vadd.f32 %v300_v27, %v259_v16  ;;  %v286_v33 = vmul.f32 %v265_v30, %v265_v30  ;;  %v267_v34 = vpop.f32.mrb[5].mxu0  ;;  %v278_v16 = vmul.f32 0.5, %v265_v30 }
 0x11f   :  { %v315_v35 = vmul.f32 0.7978846, %v307_v28  ;;  %v309_v36 = vadd.f32 %v301_v29, %v261_v19  ;;  %v287_v37 = vmul.f32 %v267_v34, %v267_v34  ;;  %v269_v38 = vpop.f32.mrb[6].mxu0  ;;  %v279_v24 = vmul.f32 0.5, %v267_v34 }
 0x120   :  { %805 = vtanh.f32 %v314_v31  ;;  %v316_v39 = vmul.f32 0.7978846, %v308_v32  ;;  %v294_v40 = vmul.f32 %v286_v33, %v265_v30  ;;  %v271_v41 = vpop.f32.mrb[7].mxu0  ;;  %v288_v44 = vmul.f32 %v269_v38, %v269_v38 }
 0x121   :  { %v317_v42 = vmul.f32 0.7978846, %v309_v36  ;;  %v295_v43 = vmul.f32 %v287_v37, %v267_v34  ;;  %v289_v46 = vmul.f32 %v271_v41, %v271_v41  ;;  %v280_v23 = vmul.f32 0.5, %v269_v38 }
 0x122   :  { %807 = vtanh.f32 %v316_v39  ;;  %v302_v45 = vmul.f32 0.044715, %v294_v40  ;;  %v296_v48 = vmul.f32 %v288_v44, %v269_v38  ;;  %v281_v19 = vmul.f32 0.5, %v271_v41 }
 0x123   :  { %v303_v47 = vmul.f32 0.044715, %v295_v43  ;;  %809 = vtanh.f32 %v315_v35  ;;  %v297_v50 = vmul.f32 %v289_v46, %v271_v41  ;;  %v384_v33 = vlaneseq }
 0x124   :  { %v310_v49 = vadd.f32 %v302_v45, %v265_v30  ;;  %811 = vtanh.f32 %v317_v42  ;;  %v304_v52 = vmul.f32 0.044715, %v296_v48  ;;  %v382_v30 = vld [vmem:[%s1083_s3] sm:$0xff] }
 0x125   :  { %v311_v51 = vadd.f32 %v303_v47, %v267_v34  ;;  %v305_v54 = vmul.f32 0.044715, %v297_v50  ;;  %v385_v35 = vshrl.u32 %v384_v33, 7  ;;  %v383_v34 = vld [vmem:[%s1083_s3 + $0x8] sm:$0xff] }
 0x126   :  { %v318_v53 = vmul.f32 0.7978846, %v310_v49  ;;  %v312_v56 = vadd.f32 %v304_v52, %v269_v38 }
 0x127   :  { %v319_v55 = vmul.f32 0.7978846, %v311_v51  ;;  %v313_v57 = vadd.f32 %v305_v54, %v271_v41  ;;  %v386_v36 = vsub.s32 0, %v385_v35 }
 0x128   :  { %813 = vtanh.f32 %v318_v53  ;;  %v320_v58 = vmul.f32 0.7978846, %v312_v56 }
 0x129   :  { %815 = vtanh.f32 %v319_v55  ;;  %v321_v60 = vmul.f32 0.7978846, %v313_v57  ;;  %v387_v37 = vrot.slane %v382_v30, %v386_v36  ;;  %v391_v38 = vrot.slane %v383_v34, %v386_v36 }
 0x12a   :  { %v806_v59 = vpop.eup %805  ;;  %817 = vtanh.f32 %v320_v58 }
 0x12b   :  { %v330_v61 = vadd.f32 1.0, %v806_v59  ;;  %819 = vtanh.f32 %v321_v60 }
 0x12c   :  { %v808_v62 = vpop.eup %807 }
 0x12d   :  { %v810_v63 = vpop.eup %809  ;;  %v332_v2 = vadd.f32 1.0, %v808_v62  ;;  %v338_v8 = vmul.f32 %v330_v61, %v274_v0 }
 0x12e   :  { %v812_v3 = vpop.eup %811  ;;  %v331_v5 = vadd.f32 1.0, %v810_v63 }
 0x12f   :  { %v333_v7 = vadd.f32 1.0, %v812_v3  ;;  %v340_v9 = vmul.f32 %v332_v2, %v276_v1 }
 0x130   :  { %v339_v10 = vmul.f32 %v331_v5, %v275_v4 }
 0x131   :  { %v341_v11 = vmul.f32 %v333_v7, %v277_v6  ;;  %v346_v13 = vpack.c.bf16 %v340_v9, %v338_v8 }
 0x132   :  { %v814_v15 = vpop.eup %813 }
 0x133   :  { %v816_v17 = vpop.eup %815  ;;  %v347_v18 = vpack.c.bf16 %v341_v11, %v339_v10  ;;  %v334_v20 = vadd.f32 1.0, %v814_v15 }
 0x134   :  { %v818_v21 = vpop.eup %817  ;;  %v335_v22 = vadd.f32 1.0, %v816_v17 }
 0x135   :  { %584 = vmatprep.mubr.bf16.mxu1 %v347_v18  ;;  %v820_v12 = vpop.eup %819  ;;  %v336_v14 = vadd.f32 1.0, %v818_v21  ;;  %v342_v26 = vmul.f32 %v334_v20, %v278_v16 }
 0x136   :  { %585 = vmatmul.mubr.bf16.vlgmr.msra.gmra.mrb[0].mxu1 %v346_v13  ;;  %v337_v25 = vadd.f32 1.0, %v820_v12  ;;  %v343_v29 = vmul.f32 %v335_v22, %v279_v24 }
 0x137   :  { %v344_v27 = vmul.f32 %v336_v14, %v280_v23 }
 0x138   :  { %v345_v28 = vmul.f32 %v337_v25, %v281_v19 }
 0x139   :  { %v348_v31 = vpack.c.bf16 %v344_v27, %v342_v26 }
 0x13a   :  { %v349_v32 = vpack.c.bf16 %v345_v28, %v343_v29 }
 0x13c   :  { %594 = vmatprep.mubr.bf16.mxu1 %v349_v32 }
 0x13e   :  { %595 = vmatmul.mubr.bf16.gmra.mrb[4].mxu1 %v348_v31 }
 0x209   :  { %v586_v39 = vpop.f32.mrb[0].mxu1 }
 0x20a   :  { %v587_v40 = vadd.f32 %v586_v39, %v387_v37  ;;  %v588_v41 = vpop.f32.mrb[1].mxu1 }
 0x20b   :  { %v589_v42 = vadd.f32 %v588_v41, %v391_v38  ;;  %v590_v43 = vpop.f32.mrb[2].mxu1 }
 0x20c   :  { %v591_v44 = vadd.f32 %v590_v43, %v387_v37  ;;  %v592_v45 = vpop.f32.mrb[3].mxu1 }
 0x20d   :  { %v705_v46 = vpack.c.bf16 %v589_v42, %v587_v40  ;;  %v593_v47 = vadd.f32 %v592_v45, %v391_v38 }
 0x20f   :  { %629 = vst [vmem:[%s1084_s4] sm:$0xff] %v705_v46  ;;  %v706_v48 = vpack.c.bf16 %v593_v47, %v591_v44 }
 0x211   :  { %630 = vst [vmem:[%s1084_s4 + $0x8] sm:$0xff] %v706_v48  ;;  %v596_v49 = vpop.f32.mrb[4].mxu1 }
 0x212   :  { %v597_v50 = vadd.f32 %v596_v49, %v387_v37  ;;  %v598_v51 = vpop.f32.mrb[5].mxu1 }
 0x213   :  { %v599_v52 = vadd.f32 %v598_v51, %v391_v38  ;;  %v600_v53 = vpop.f32.mrb[6].mxu1 }
 0x214   :  { %v601_v54 = vadd.f32 %v600_v53, %v387_v37  ;;  %v602_v55 = vpop.f32.mrb[7].mxu1 }
 0x215   :  { %v707_v56 = vpack.c.bf16 %v599_v52, %v597_v50  ;;  %v603_v57 = vadd.f32 %v602_v55, %v391_v38 }
 0x217   :  { %631 = vst [vmem:[%s1084_s4 + $0x10] sm:$0xff] %v707_v56  ;;  %v708_v58 = vpack.c.bf16 %v603_v57, %v601_v54 }
 0x219   :  { %632 = vst [vmem:[%s1084_s4 + $0x18] sm:$0xff] %v708_v58 }

</bundles_post_ra>
